<compile_context>
chip_gen: v7x
topology: tpu7x:2x2x1
jax: 0.10.0
libtpu: 0.0.40
codegen_flags: <defaults>
</compile_context>

<pallas_src>
import functools

import jax
import jax.numpy as jnp
from jax.experimental import pallas as pl
from jax.experimental.pallas import tpu as pltpu


_VMEM_LIMIT_BYTES = 48 * 1024 * 1024   # safe on v5e/v6e (128 MiB) and v7x (64 MiB physical)
_VMEM_BUDGET_BYTES = 36 * 1024 * 1024  # ~75% of the limit -> headroom for the compiler


def _loss_partial_kernel(x_ref, y_ref, area_ref, out_ref, *, n_rows, block_rows):
    """One grid step: area-weighted sum of squared error over a block of rows."""
    x = x_ref[...].astype(jnp.float32)          # (TN, H, W)
    y = y_ref[...].astype(jnp.float32)
    diff = x - y
    d2 = diff * diff
    area = area_ref[...].astype(jnp.float32)    # (H, W)

    if n_rows % block_rows != 0:
        # Last block may read padded (garbage) rows; mask them out. Reduce the
        # lane axis first so the mask/iota stays 2D (sublane iota along dim 0).
        i = pl.program_id(0)
        limit = n_rows - i * block_rows         # number of valid rows in block
        w2 = d2 * area                          # (TN, H, W); area broadcasts
        per_row = jnp.sum(w2, axis=-1)          # (TN, H)
        row_ids = jax.lax.broadcasted_iota(jnp.int32, per_row.shape, 0)
        per_row = jnp.where(row_ids < limit, per_row, 0.0)
        partial = jnp.sum(per_row)
    else:
        # Fold the row axis with pure VPU adds, then one XLU reduce per block.
        slab = jnp.sum(d2, axis=0)              # (H, W)
        partial = jnp.sum(slab * area)

    # Per-block partial sum, written lane-dense into its own (1, 8, 128) block.
    out_ref[...] = jnp.full(out_ref.shape, partial, dtype=out_ref.dtype)


def _pick_block_rows(n_rows, h, w, itemsize, budget_bytes=_VMEM_BUDGET_BYTES):
    """Largest row-block keeping double-buffered inputs within the VMEM budget."""
    slab_bytes = h * w * itemsize
    per_row = 2 * 2 * slab_bytes                 # 2 inputs x 2 pipeline buffers
    fixed = 2 * h * w * 4 + 2 * 8 * 128 * 4      # area (f32, 2 bufs) + out partials
    avail = budget_bytes - fixed
    tn = avail // per_row if avail > 0 else 1
    tn = int(max(1, min(tn, n_rows, 1024)))
    if tn >= 8:
        tn = (tn // 8) * 8                       # keep sublane-aligned row groups
    return tn


def cell_area_weighted_loss(invar, outvar, area):
    """Forward of CustomCellAreaWeightedLossFunction as a Pallas TPU kernel."""
    T, C, H, W = invar.shape
    assert outvar.shape == (T, C, H, W)
    assert area.shape == (H, W)

    n_rows = T * C
    x = invar.reshape(n_rows, H, W)              # free: merges leading dims only
    y = outvar.reshape(n_rows, H, W)

    block_rows = _pick_block_rows(n_rows, H, W, jnp.dtype(invar.dtype).itemsize)
    num_blocks = (n_rows + block_rows - 1) // block_rows

    kernel = functools.partial(
        _loss_partial_kernel, n_rows=n_rows, block_rows=block_rows
    )

    partials = pl.pallas_call(
        kernel,
        out_shape=jax.ShapeDtypeStruct((num_blocks, 8, 128), jnp.float32),
        grid=(num_blocks,),
        in_specs=[
            pl.BlockSpec((block_rows, H, W), lambda i: (i, 0, 0)),
            pl.BlockSpec((block_rows, H, W), lambda i: (i, 0, 0)),
            pl.BlockSpec((H, W), lambda i: (0, 0)),   # resident; DMA'd once
        ],
        out_specs=pl.BlockSpec((1, 8, 128), lambda i: (i, 0, 0)),
        compiler_params=pltpu.CompilerParams(
            dimension_semantics=("parallel",),
            vmem_limit_bytes=_VMEM_LIMIT_BYTES,
        ),
    )(x, y, area)

    inv_denom = 1.0 / float(T * C * H * W)
    return jnp.sum(partials[:, 0, 0]) * inv_denom


def _reference_loss(invar, outvar, area):
    loss = (invar.astype(jnp.float32) - outvar.astype(jnp.float32)) ** 2
    loss = loss.mean(axis=(0, 1))
    loss = loss * area
    return loss.mean()


if __name__ == "__main__":
    key = jax.random.PRNGKey(0)
    k1, k2, k3, k4 = jax.random.split(key, 4)

    # Case 1: small shapes consistent with the module ([T, C, H, W] + [H, W]).
    T, C, H, W = 2, 4, 16, 16
    invar = jax.random.normal(k1, (T, C, H, W), dtype=jnp.float32)
    outvar = jax.random.normal(k2, (T, C, H, W), dtype=jnp.float32)
    area = jax.nn.softplus(jax.random.normal(k3, (H, W), dtype=jnp.float32))

    loss = jax.block_until_ready(cell_area_weighted_loss(invar, outvar, area))
    ref = _reference_loss(invar, outvar, area)
    assert jnp.allclose(loss, ref, rtol=1e-5, atol=1e-6), (loss, ref)

    # Case 2: T*C not divisible by the row block -> exercises the masked path.
    T2, C2 = 3, 5
    invar2 = jax.random.normal(k4, (T2, C2, H, W), dtype=jnp.float32)
    outvar2 = invar2 + 0.5 * jax.random.normal(k1, (T2, C2, H, W), dtype=jnp.float32)
    loss2 = jax.block_until_ready(cell_area_weighted_loss(invar2, outvar2, area))
    ref2 = _reference_loss(invar2, outvar2, area)
    assert jnp.allclose(loss2, ref2, rtol=1e-5, atol=1e-6), (loss2, ref2)

    # Case 3: bf16 activations consumed directly (halves HBM traffic).
    loss3 = jax.block_until_ready(
        cell_area_weighted_loss(
            invar.astype(jnp.bfloat16), outvar.astype(jnp.bfloat16), area
        )
    )
    ref3 = _reference_loss(
        invar.astype(jnp.bfloat16), outvar.astype(jnp.bfloat16), area
    )
    assert jnp.allclose(loss3, ref3, rtol=1e-3, atol=1e-4), (loss3, ref3)

    print("KERNEL_OK")
</pallas_src>

<mosaic_0001>
module attributes {stable_mosaic.version = 11 : i64} {
  func.func @_loss_partial_kernel(%arg0: i32, %arg1: memref<8x16x16xf32, #tpu.memory_space<vmem>>, %arg2: memref<8x16x16xf32, #tpu.memory_space<vmem>>, %arg3: memref<16x16xf32, #tpu.memory_space<vmem>>, %arg4: memref<1x8x128xf32, #tpu.memory_space<vmem>>) attributes {dimension_semantics = [#tpu.dimension_semantics<parallel>], iteration_bounds = array<i64: 1>, scalar_prefetch = 0 : i64, scratch_operands = 0 : i64, tpu.core_type = #tpu.core_type<tc>, window_params = [{transform_indices = @transform_0, window_bounds = array<i64: 8, 16, 16>}, {transform_indices = @transform_1, window_bounds = array<i64: 8, 16, 16>}, {pipeline_mode = #tpu.pipeline_mode<synchronous>, transform_indices = @transform_2, window_bounds = array<i64: 16, 16>}, {transform_indices = @transform_3, window_bounds = array<i64: 1, 8, 128>}]} {
    %c0 = arith.constant 0 : index
    %c0_0 = arith.constant 0 : index
    %c0_1 = arith.constant 0 : index
    %0 = vector.load %arg1[%c0, %c0_0, %c0_1] : memref<8x16x16xf32, #tpu.memory_space<vmem>>, vector<8x16x16xf32>
    %c0_2 = arith.constant 0 : index
    %c0_3 = arith.constant 0 : index
    %c0_4 = arith.constant 0 : index
    %1 = vector.load %arg2[%c0_2, %c0_3, %c0_4] : memref<8x16x16xf32, #tpu.memory_space<vmem>>, vector<8x16x16xf32>
    %2 = arith.subf %0, %1 : vector<8x16x16xf32>
    %3 = arith.mulf %2, %2 : vector<8x16x16xf32>
    %c0_5 = arith.constant 0 : index
    %c0_6 = arith.constant 0 : index
    %4 = vector.load %arg3[%c0_5, %c0_6] : memref<16x16xf32, #tpu.memory_space<vmem>>, vector<16x16xf32>
    %cst = arith.constant dense<0.000000e+00> : vector<16x16xf32>
    %5 = vector.multi_reduction <add>, %3, %cst [0] : vector<8x16x16xf32> to vector<16x16xf32>
    %6 = arith.mulf %5, %4 : vector<16x16xf32>
    %7 = vector.shape_cast %6 : vector<16x16xf32> to vector<1x16x16xf32>
    %cst_7 = arith.constant dense<0.000000e+00> : vector<1xf32>
    %8 = vector.multi_reduction <add>, %7, %cst_7 [1, 2] : vector<1x16x16xf32> to vector<1xf32>
    %9 = vector.shape_cast %8 : vector<1xf32> to vector<1x1x1xf32>
    %10 = vector.extract %9[0, 0, 0] : f32 from vector<1x1x1xf32>
    %11 = vector.broadcast %10 : f32 to vector<1x8x128xf32>
    %c0_8 = arith.constant 0 : index
    %c0_9 = arith.constant 0 : index
    %c0_10 = arith.constant 0 : index
    %12 = vector.load %arg4[%c0_8, %c0_9, %c0_10] : memref<1x8x128xf32, #tpu.memory_space<vmem>>, vector<1x8x128xf32>
    tpu.vector_store %arg4[%c0_8, %c0_9, %c0_10], %11 {strides = array<i32>} : memref<1x8x128xf32, #tpu.memory_space<vmem>>, vector<1x8x128xf32>,
    return
  }
  func.func @transform_0(%arg0: i32) -> (i32, i32, i32) {
    %c0_i32 = arith.constant 0 : i32
    %c0_i32_0 = arith.constant 0 : i32
    %c0_i32_1 = arith.constant 0 : i32
    return %arg0, %c0_i32, %c0_i32_0 : i32, i32, i32
  }
  func.func @transform_1(%arg0: i32) -> (i32, i32, i32) {
    %c0_i32 = arith.constant 0 : i32
    %c0_i32_0 = arith.constant 0 : i32
    %c0_i32_1 = arith.constant 0 : i32
    return %arg0, %c0_i32, %c0_i32_0 : i32, i32, i32
  }
  func.func @transform_2(%arg0: i32) -> (i32, i32) {
    %c0_i32 = arith.constant 0 : i32
    %c0_i32_0 = arith.constant 0 : i32
    %c0_i32_1 = arith.constant 0 : i32
    return %c0_i32, %c0_i32_0 : i32, i32
  }
  func.func @transform_3(%arg0: i32) -> (i32, i32, i32) {
    %c0_i32 = arith.constant 0 : i32
    %c0_i32_0 = arith.constant 0 : i32
    %c0_i32_1 = arith.constant 0 : i32
    return %arg0, %c0_i32, %c0_i32_0 : i32, i32, i32
  }
}

</mosaic_0001>

<bundles_post_ra>
// kernel: tpu_custom_call.1
= control target key start
LH: loop header
LB: loop body
LE: loop exit
PB: predicated region body
PF: predicated region fallthrough
CT: control target
= control target key end

     0   :  { %8 = vsyncpa [#allocation3], 0  ;;  %s395_s0 = inlined_call_operand.hbm [shape: f32[8,16,16], index: 0, kind: input, shape index: {}]   ;;  %s396_s1 = inlined_call_operand.hbm [shape: f32[8,16,16], index: 1, kind: input, shape index: {}]   ;;  %s397_s2 = inlined_call_operand.hbm [shape: f32[16,16], index: 2, kind: input, shape index: {}]   ;;  %s398_s3 = inlined_call_operand.hbm [shape: f32[1,8,128], index: 3, kind: output, shape index: {}]  }
   0x1   :  { %9 = vsyncpa [#allocation6], 0 }
   0x2   :  { %10 = vsyncpa [#allocation4], 0  ;;  %s287_s12 = smov [#allocation5]   ;;  %s288_s14 = smov [#allocation2]  }
   0x3   :  { %s28_s13 = sshll.u32 %s287_s12, 4  ;;  %s16_s15 = sshll.u32 %s288_s14, 4  ;;  %s29_s13 = int_to_ptr.vmem [resolvable:$true] %s28_s13  ;;  %s313_s15 = int_to_ptr.vmem [resolvable:$true] %s16_s15 }
   0x4   :  { %s193_s18 = scalar_lea.hbm %s396_s1, 2048 }
   0x5   :  { %p194_p0 = scmp.ne.s32.totalorder %s396_s1, %s193_s18  ;;  %p197_p1 = scmp.lt.u32.totalorder %s193_s18, %s396_s1 }
   0x7   :  { %p199_p2 = pnand %p197_p1, %p194_p0 }
   0x9   :  { %202 = shalt.err (!%p199_p2)
}
   0xa   :  { %s203_s23 = scalar_lea.vmem %s29_s13, 2048  ;;  %p208_p4 = scmp.lt.s32.totalorder %s29_s13, %s29_s13 }
   0xb   :  { %p204_p3 = scmp.ne.s32.totalorder %s29_s13, %s203_s23  ;;  %p209_p5 = scmp.lt.s32.totalorder %s203_s23, %s203_s23 }
   0xd   :  { %p210_p6 = por %p209_p5, %p208_p4 }
   0xf   :  { %p211_p7 = pnand %p210_p6, %p204_p3 }
  0x11   :  { %214 = shalt.err (!%p211_p7)
}
  0x12   :  { %s289_s24 = smov 128   ;;  %s290_s25 = smov 8  }
  0x13   :  { %34 = dma.hbm_to_vmem [thread:$0]  %s396_s1, 2048, %s29_s13, [#allocation6], %s289_s24, %s289_s24, %s290_s25  }
  0x14   :  { %s215_s30 = scalar_lea.hbm %s395_s0, 2048 }
  0x15   :  { %p216_p8 = scmp.ne.s32.totalorder %s395_s0, %s215_s30  ;;  %p219_p9 = scmp.lt.u32.totalorder %s215_s30, %s395_s0 }
  0x17   :  { %p221_p10 = pnand %p219_p9, %p216_p8 }
  0x19   :  { %224 = shalt.err (!%p221_p10)
}
  0x1a   :  { %s225_s8 = scalar_lea.vmem %s313_s15, 2048  ;;  %p230_p12 = scmp.lt.s32.totalorder %s313_s15, %s313_s15 }
  0x1b   :  { %p226_p11 = scmp.ne.s32.totalorder %s313_s15, %s225_s8  ;;  %p231_p13 = scmp.lt.s32.totalorder %s225_s8, %s225_s8 }
  0x1d   :  { %p232_p0 = por %p231_p13, %p230_p12 }
  0x1f   :  { %p233_p1 = pnand %p232_p0, %p226_p11 }
  0x21   :  { %236 = shalt.err (!%p233_p1)
}
  0x22   :  { %22 = dma.hbm_to_vmem [thread:$0]  %s395_s0, 2048, %s313_s15, [#allocation3], %s289_s24, %s289_s24, %s290_s25  }
  0x23   :  { %s291_s10 = smov [#allocation7]   ;;  %s237_s14 = scalar_lea.hbm %s397_s2, 256 }
  0x24   :  { %s40_s11 = sshll.u32 %s291_s10, 4  ;;  %p238_p2 = scmp.ne.s32.totalorder %s397_s2, %s237_s14  ;;  %s41_s11 = int_to_ptr.vmem [resolvable:$true] %s40_s11 }
  0x25   :  { %p241_p3 = scmp.lt.u32.totalorder %s237_s14, %s397_s2 }
  0x27   :  { %p243_p4 = pnand %p241_p3, %p238_p2 }
  0x29   :  { %246 = shalt.err (!%p243_p4)
}
  0x2a   :  { %s247_s20 = scalar_lea.vmem %s41_s11, 256  ;;  %p252_p6 = scmp.lt.s32.totalorder %s41_s11, %s41_s11 }
  0x2b   :  { %p248_p5 = scmp.ne.s32.totalorder %s41_s11, %s247_s20  ;;  %p253_p7 = scmp.lt.s32.totalorder %s247_s20, %s247_s20 }
  0x2d   :  { %p254_p8 = por %p253_p7, %p252_p6 }
  0x2f   :  { %p255_p9 = pnand %p254_p8, %p248_p5 }
  0x31   :  { %258 = shalt.err (!%p255_p9)
}
  0x32   :  { %46 = dma.hbm_to_vmem [thread:$0]  %s397_s2, 256, %s41_s11, [#allocation6], %s289_s24, %s289_s24, %s290_s25  }
  0x33   :  { %281 = dma.done.wait [#allocation3], 2048  }
  0x34   :  { %282 = vsyncadd [#allocation3], 4294965248 }
  0x35   :  { %283 = dma.done.wait [#allocation6], 2304  }
  0x36   :  { %284 = vsyncadd [#allocation6], 4294964992  ;;  %v56_v0 = vld [vmem:[#allocation2] sm:$0xff]  ;;  %v58_v1 = vld [vmem:[#allocation2 + $0x10] sm:$0xff]  ;;  %vm122_vm0 = vcmask 130048   ;;  %s292_s2 = smov [#allocation8]  }
  0x37   :  { %v57_v2 = vld [vmem:[#allocation2 + $0x8] sm:$0xff]  ;;  %v59_v3 = vld [vmem:[#allocation2 + $0x18] sm:$0xff]  ;;  %v60_v4 = vld [vmem:[#allocation2 + $0x20] sm:$0xff]  ;;  %s175_s21 = sshll.u32 %s292_s2, 4  ;;  %s176_s21 = int_to_ptr.vmem [resolvable:$true] %s175_s21 }
  0x38   :  { %v61_v5 = vld [vmem:[#allocation2 + $0x28] sm:$0xff]  ;;  %v62_v6 = vld [vmem:[#allocation2 + $0x30] sm:$0xff]  ;;  %v72_v7 = vld [vmem:[#allocation5] sm:$0xff]  ;;  %s259_s23 = scalar_lea.vmem %s176_s21, 128  ;;  %p264_p11 = scmp.lt.s32.totalorder %s176_s21, %s176_s21 }
  0x39   :  { %v73_v8 = vld [vmem:[#allocation5 + $0x8] sm:$0xff]  ;;  %v63_v9 = vld [vmem:[#allocation2 + $0x38] sm:$0xff]  ;;  %v74_v10 = vld [vmem:[#allocation5 + $0x10] sm:$0xff]  ;;  %v88_v13 = vsub.f32 %v56_v0, %v72_v7  ;;  %p260_p10 = scmp.ne.s32.totalorder %s176_s21, %s259_s23  ;;  %p265_p12 = scmp.lt.s32.totalorder %s259_s23, %s259_s23 }
  0x3a   :  { %v75_v11 = vld [vmem:[#allocation5 + $0x18] sm:$0xff]  ;;  %v76_v12 = vld [vmem:[#allocation5 + $0x20] sm:$0xff]  ;;  %v77_v15 = vld [vmem:[#allocation5 + $0x28] sm:$0xff]  ;;  %v90_v17 = vsub.f32 %v58_v1, %v74_v10  ;;  %v89_v25 = vsub.f32 %v57_v2, %v73_v8 }
  0x3b   :  { %v64_v14 = vld [vmem:[#allocation2 + $0x40] sm:$0xff]  ;;  %v78_v16 = vld [vmem:[#allocation5 + $0x30] sm:$0xff]  ;;  %v92_v18 = vsub.f32 %v60_v4, %v76_v12  ;;  %v65_v19 = vld [vmem:[#allocation2 + $0x48] sm:$0xff]  ;;  %v91_v26 = vsub.f32 %v59_v3, %v75_v11  ;;  %v93_v27 = vsub.f32 %v61_v5, %v77_v15  ;;  %v104_v32 = vmul.f32 %v88_v13, %v88_v13  ;;  %p266_p13 = por %p265_p12, %p264_p11 }
  0x3c   :  { %v79_v20 = vld [vmem:[#allocation5 + $0x38] sm:$0xff]  ;;  %v80_v21 = vld [vmem:[#allocation5 + $0x40] sm:$0xff]  ;;  %v66_v22 = vld [vmem:[#allocation2 + $0x50] sm:$0xff]  ;;  %v94_v28 = vsub.f32 %v62_v6, %v78_v16  ;;  %v106_v38 = vmul.f32 %v90_v17, %v90_v17  ;;  %v105_v44 = vmul.f32 %v89_v25, %v89_v25 }
  0x3d   :  { %v81_v23 = vld [vmem:[#allocation5 + $0x48] sm:$0xff]  ;;  %v82_v24 = vld [vmem:[#allocation5 + $0x50] sm:$0xff]  ;;  %v67_v29 = vld [vmem:[#allocation2 + $0x58] sm:$0xff]  ;;  %v95_v36 = vsub.f32 %v63_v9, %v79_v20  ;;  %v96_v37 = vsub.f32 %v64_v14, %v80_v21  ;;  %v108_v39 = vmul.f32 %v92_v18, %v92_v18  ;;  %v107_v45 = vmul.f32 %v91_v26, %v91_v26  ;;  %p267_p0 = pnand %p266_p13, %p260_p10 }
  0x3e   :  { %v68_v30 = vld [vmem:[#allocation2 + $0x60] sm:$0xff]  ;;  %v69_v31 = vld [vmem:[#allocation2 + $0x68] sm:$0xff]  ;;  %v83_v33 = vld [vmem:[#allocation5 + $0x58] sm:$0xff]  ;;  %v97_v40 = vsub.f32 %v65_v19, %v81_v23  ;;  %v98_v41 = vsub.f32 %v66_v22, %v82_v24  ;;  %v109_v46 = vmul.f32 %v93_v27, %v93_v27  ;;  %v110_v47 = vmul.f32 %v94_v28, %v94_v28 }
  0x3f   :  { %v84_v34 = vld [vmem:[#allocation5 + $0x60] sm:$0xff]  ;;  %v85_v35 = vld [vmem:[#allocation5 + $0x68] sm:$0xff]  ;;  %v70_v42 = vld [vmem:[#allocation2 + $0x70] sm:$0xff]  ;;  %v99_v48 = vsub.f32 %v67_v29, %v83_v33  ;;  %v123_v51 = vsel %vm122_vm0, %v104_v32, 0.0  ;;  %v111_v54 = vmul.f32 %v95_v36, %v95_v36  ;;  %v112_v55 = vmul.f32 %v96_v37, %v96_v37 }
  0x40   :  { %v86_v43 = vld [vmem:[#allocation5 + $0x70] sm:$0xff]  ;;  %v100_v49 = vsub.f32 %v68_v30, %v84_v34  ;;  %v101_v50 = vsub.f32 %v69_v31, %v85_v35  ;;  %v71_v52 = vld [vmem:[#allocation2 + $0x78] sm:$0xff]  ;;  %v124_v56 = vsel %vm122_vm0, %v106_v38, 0.0  ;;  %v126_v57 = vsel %vm122_vm0, %v108_v39, 0.0  ;;  %v120_v26 = vld [vmem:[#allocation7] sm:$0xff] }
  0x41   :  { %v87_v53 = vld [vmem:[#allocation5 + $0x78] sm:$0xff]  ;;  %v102_v58 = vsub.f32 %v70_v42, %v86_v43  ;;  %v113_v59 = vmul.f32 %v97_v40, %v97_v40  ;;  %v114_v60 = vmul.f32 %v98_v41, %v98_v41  ;;  %v125_v61 = vadd.f32 %v124_v56, %v123_v51  ;;  %v121_v30 = vld [vmem:[#allocation7 + $0x8] sm:$0xff] }
  0x42   :  { %v128_v62 = vsel %vm122_vm0, %v110_v47, 0.0  ;;  %v138_v63 = vsel %vm122_vm0, %v105_v44, 0.0  ;;  %v139_v0 = vsel %vm122_vm0, %v107_v45, 0.0  ;;  %v141_v1 = vsel %vm122_vm0, %v109_v46, 0.0 }
  0x43   :  { %v103_v2 = vsub.f32 %v71_v52, %v87_v53  ;;  %v127_v3 = vadd.f32 %v126_v57, %v125_v61  ;;  %v140_v4 = vadd.f32 %v139_v0, %v138_v63  ;;  %v115_v5 = vmul.f32 %v99_v48, %v99_v48 }
  0x44   :  { %v116_v6 = vmul.f32 %v100_v49, %v100_v49  ;;  %v130_v7 = vsel %vm122_vm0, %v112_v55, 0.0  ;;  %v143_v8 = vsel %vm122_vm0, %v111_v54, 0.0  ;;  %v117_v11 = vmul.f32 %v101_v50, %v101_v50 }
  0x45   :  { %v129_v9 = vadd.f32 %v128_v62, %v127_v3  ;;  %v142_v10 = vadd.f32 %v141_v1, %v140_v4  ;;  %v118_v12 = vmul.f32 %v102_v58, %v102_v58  ;;  %v132_v13 = vsel %vm122_vm0, %v114_v60, 0.0 }
  0x46   :  { %v145_v14 = vsel %vm122_vm0, %v113_v59, 0.0  ;;  %v119_v17 = vmul.f32 %v103_v2, %v103_v2  ;;  %v134_v18 = vsel %vm122_vm0, %v116_v6, 0.0  ;;  %v147_v19 = vsel %vm122_vm0, %v115_v5, 0.0 }
  0x47   :  { %v131_v15 = vadd.f32 %v130_v7, %v129_v9  ;;  %v144_v16 = vadd.f32 %v143_v8, %v142_v10  ;;  %v136_v22 = vsel %vm122_vm0, %v118_v12, 0.0  ;;  %v149_v23 = vsel %vm122_vm0, %v117_v11, 0.0 }
  0x48   :  { %v151_v27 = vsel %vm122_vm0, %v119_v17, 0.0 }
  0x49   :  { %v133_v20 = vadd.f32 %v132_v13, %v131_v15  ;;  %v146_v21 = vadd.f32 %v145_v14, %v144_v16 }
  0x4b   :  { %v135_v24 = vadd.f32 %v134_v18, %v133_v20  ;;  %v148_v25 = vadd.f32 %v147_v19, %v146_v21 }
  0x4d   :  { %v137_v28 = vadd.f32 %v136_v22, %v135_v24  ;;  %v150_v29 = vadd.f32 %v149_v23, %v148_v25 }
  0x4f   :  { %v152_v31 = vadd.f32 %v151_v27, %v150_v29  ;;  %v153_v32 = vmul.f32 %v137_v28, %v120_v26 }
  0x51   :  { %v154_v33 = vmul.f32 %v152_v31, %v121_v30  ;;  %v155_v34 = vsel %vm122_vm0, %v153_v32, 0.0 }
  0x53   :  { %v156_v35 = vsel %vm122_vm0, %v154_v33, 0.0 }
  0x54   :  { %v157_v36 = vadd.f32 %v156_v35, %v155_v34 }
  0x56   :  { %158 = vadd.xlane.f32.xlu0 %v157_v36 }
  0xe3   :  { %v159_v37 = vpop.xlane.xlu0 %158 }
  0xe4   :  { %v160_v38 = vrot.slane %v159_v37, 4 }
  0xe6   :  { %v161_v39 = vadd.f32 %v160_v38, %v159_v37 }
  0xe8   :  { %v162_v40 = vrot.slane %v161_v39, 2 }
  0xea   :  { %v163_v41 = vadd.f32 %v162_v40, %v161_v39 }
  0xec   :  { %v164_v42 = vrot.slane %v163_v41, 1 }
  0xee   :  { %v165_v43 = vadd.f32 %v164_v42, %v163_v41 }
  0xf0   :  { %185 = vpush %v165_v43 }
 0x121   :  { %s186_s22 = spop %185 }
 0x122   :  { %v167_v44 = vstv %s186_s22 }
 0x123   :  { %168 = vst [vmem:[#allocation8] sm:$0xff] %v167_v44 }
 0x124   :  { %270 = shalt.err (!%p267_p0)
}
 0x125   :  { %s271_s26 = scalar_lea.hbm %s398_s3, 128 }
 0x126   :  { %p272_p1 = scmp.ne.s32.totalorder %s398_s3, %s271_s26  ;;  %p275_p2 = scmp.lt.u32.totalorder %s271_s26, %s398_s3 }
 0x128   :  { %p277_p3 = pnand %p275_p2, %p272_p1 }
 0x12a   :  { %280 = shalt.err (!%p277_p3)
}
 0x12b   :  { %178 = dma.vmem_to_hbm [thread:$0]  %s176_s21, 128, %s398_s3, [#allocation4]  }
 0x12c   :  { %285 = dma.done.wait [#allocation4], 128  }
 0x12d   :  { %286 = vsyncadd [#allocation4], 4294967168 }
 0x12e   :  { %182 = vsyncpa [#allocation3], 1 }
 0x12f   :  { %183 = vsyncpa [#allocation6], 1 }
 0x130   :  { %184 = vsyncpa [#allocation4], 1 }

</bundles_post_ra>
